<compile_context>
chip_gen: v7x
topology: tpu7x:2x2x1
jax: 0.10.0
libtpu: 0.0.40
codegen_flags: <defaults>
</compile_context>

<pallas_src>
import jax
import jax.numpy as jnp
import numpy as np
from jax.experimental import pallas as pl
from jax.experimental.pallas import tpu as pltpu


def _row_shift(src, d):
    """Return r with r[i, :] = src[i + d, :], zeros where i + d is out of range."""
    if d == 0:
        return src
    rows = src.shape[0]
    rolled = pltpu.roll(src, shift=(-d) % rows, axis=0)          # XLU sublane roll
    rid = jax.lax.broadcasted_iota(jnp.int32, src.shape, 0)
    mask = rid >= (-d) if d < 0 else rid < rows - d
    return jnp.where(mask, rolled, 0.0)


def basic_block_kernel(x_ref, w1_ref, s1_ref, b1_ref, w2_ref, s2_ref, b2_ref,
                       out_ref):
    # x_ref  : (1, H, W*Cin)       f32   one batch element, (W, C) folded into lanes
    # w*_ref : (3, W*Cin, W*Cout)  bf16  banded Toeplitz conv weights (one per ky tap)
    # s*/b*  : (1, W*Cout)         f32   folded BN scale / bias (tiled along W)
    # out_ref: (1, H, W*Cout)      f32   lane-dense output slab
    x2 = x_ref[0]                                                # (H, W*Cin) f32

    def conv3x3(src, w_ref):
        # src: (H, W*Cin) f32  ->  (H, W*Cout) f32 accumulator.
        # Accumulator is initialized by the first tap's dot (no zeros pass).
        acc = jnp.dot(_row_shift(src, -1).astype(jnp.bfloat16), w_ref[0],
                      preferred_element_type=jnp.float32)
        acc += jnp.dot(src.astype(jnp.bfloat16), w_ref[1],
                       preferred_element_type=jnp.float32)
        acc += jnp.dot(_row_shift(src, 1).astype(jnp.bfloat16), w_ref[2],
                       preferred_element_type=jnp.float32)
        return acc

    # conv1 -> bn1 (folded) -> relu               (all epilogue math in f32)
    h1 = jnp.maximum(conv3x3(x2, w1_ref) * s1_ref[...] + b1_ref[...], 0.0)

    # conv2 -> bn2 (folded) -> +identity (f32) -> relu
    y = conv3x3(h1, w2_ref) * s2_ref[...] + b2_ref[...] + x2
    out_ref[0] = jnp.maximum(y, 0.0)


def fold_bn(gamma, beta, mean, var, eps=1e-5):
    scale = gamma / jnp.sqrt(var + eps)
    bias = beta - mean * scale
    return scale, bias


def toeplitz_conv_weights(w_hwio, width):
    """Fold the kx (column) taps of a KHxKW 'SAME' conv into a banded matrix.

    w_hwio: (KH, KW, Cin, Cout).  Returns (KH, width*Cin, width*Cout) with
      out[ky][j2*Cin + ci, j*Cout + co] = w_hwio[ky, j2 - j + KW//2, ci, co]
    and zero where the tap falls outside the kernel support.
    """
    KH, KW, Cin, Cout = w_hwio.shape
    j2 = jnp.arange(width)[:, None]                  # source spatial column
    j = jnp.arange(width)[None, :]                   # output spatial column
    kx = j2 - j + KW // 2
    valid = (kx >= 0) & (kx < KW)
    wk = w_hwio[:, jnp.clip(kx, 0, KW - 1)]          # (KH, width, width, Cin, Cout)
    wk = jnp.where(valid[None, :, :, None, None], wk, 0.0)
    wk = jnp.transpose(wk, (0, 1, 3, 2, 4))          # (KH, j2, Cin, j, Cout)
    return wk.reshape(KH, width * Cin, width * Cout)


def basic_block_forward(x_nchw, w1, bn1, w2, bn2, eps=1e-5):
    """x_nchw: (N, C, H, W).  w1/w2: (Cout, Cin, 3, 3) torch layout.
       bn1/bn2: (gamma, beta, running_mean, running_var) each of shape (Cout,)."""
    N, C, H, W = x_nchw.shape
    P = w1.shape[0]
    assert P == C and w2.shape[0] == P and w2.shape[1] == P, \
        "stride=1 / no-downsample BasicBlock (inplanes == planes)"

    # NCHW -> NHWC -> fold (W, C) into the lane axis: (N, H, W*C), f32.
    x2 = jnp.transpose(x_nchw, (0, 2, 3, 1)).reshape(N, H, W * C).astype(jnp.float32)

    # OIHW -> HWIO -> banded Toeplitz (kx folded in), bf16 for the MXU.
    w1_hwio = jnp.transpose(w1, (2, 3, 1, 0)).astype(jnp.float32)
    w2_hwio = jnp.transpose(w2, (2, 3, 1, 0)).astype(jnp.float32)
    w1_big = toeplitz_conv_weights(w1_hwio, W).astype(jnp.bfloat16)  # (3, W*C, W*P)
    w2_big = toeplitz_conv_weights(w2_hwio, W).astype(jnp.bfloat16)  # (3, W*P, W*P)

    # Folded eval-mode BN; tile along W so it broadcasts in the folded layout.
    s1, b1 = fold_bn(*bn1, eps=eps)
    s2, b2 = fold_bn(*bn2, eps=eps)
    s1 = jnp.tile(s1, W).reshape(1, W * P)
    b1 = jnp.tile(b1, W).reshape(1, W * P)
    s2 = jnp.tile(s2, W).reshape(1, W * P)
    b2 = jnp.tile(b2, W).reshape(1, W * P)

    out2 = pl.pallas_call(
        basic_block_kernel,
        out_shape=jax.ShapeDtypeStruct((N, H, W * P), jnp.float32),
        grid_spec=pltpu.PrefetchScalarGridSpec(
            num_scalar_prefetch=0,
            grid=(N,),                               # one batch element per step
            in_specs=[
                pl.BlockSpec((1, H, W * C), lambda n: (n, 0, 0)),
                pl.BlockSpec((3, W * C, W * P), lambda n: (0, 0, 0)),
                pl.BlockSpec((1, W * P), lambda n: (0, 0)),
                pl.BlockSpec((1, W * P), lambda n: (0, 0)),
                pl.BlockSpec((3, W * P, W * P), lambda n: (0, 0, 0)),
                pl.BlockSpec((1, W * P), lambda n: (0, 0)),
                pl.BlockSpec((1, W * P), lambda n: (0, 0)),
            ],
            out_specs=pl.BlockSpec((1, H, W * P), lambda n: (n, 0, 0)),
        ),
        compiler_params=pltpu.CompilerParams(
            dimension_semantics=("parallel",)),      # feeds both TCs on v7x (N>=2)
    )(x2, w1_big, s1, b1, w2_big, s2, b2)

    # (N, H, W*P) -> NHWC -> NCHW
    return jnp.transpose(out2.reshape(N, H, W, P), (0, 3, 1, 2))


def reference_forward(x, w1, bn1, w2, bn2, eps=1e-5):
    """Plain-JAX reference (eval-mode BN), NCHW throughout."""
    s1, b1 = fold_bn(*bn1, eps=eps)
    s2, b2 = fold_bn(*bn2, eps=eps)
    dn = ('NCHW', 'OIHW', 'NCHW')
    y = jax.lax.conv_general_dilated(x, w1, (1, 1), 'SAME', dimension_numbers=dn)
    y = jnp.maximum(y * s1[None, :, None, None] + b1[None, :, None, None], 0.0)
    y = jax.lax.conv_general_dilated(y, w2, (1, 1), 'SAME', dimension_numbers=dn)
    y = y * s2[None, :, None, None] + b2[None, :, None, None]
    return jnp.maximum(y + x, 0.0)


if __name__ == "__main__":
    key = jax.random.PRNGKey(0)
    N, C, H, W = 2, 4, 16, 16            # inplanes = planes = 4, stride = 1
    ks = jax.random.split(key, 8)

    x = jax.random.normal(ks[0], (N, C, H, W), jnp.float32)
    w1 = jax.random.normal(ks[1], (C, C, 3, 3), jnp.float32) * 0.2
    w2 = jax.random.normal(ks[2], (C, C, 3, 3), jnp.float32) * 0.2
    bn1 = (1.0 + 0.1 * jax.random.normal(ks[3], (C,), jnp.float32),   # gamma
           0.1 * jax.random.normal(ks[4], (C,), jnp.float32),         # beta
           0.1 * jax.random.normal(ks[5], (C,), jnp.float32),         # running_mean
           1.0 + 0.1 * jnp.abs(jax.random.normal(ks[6], (C,), jnp.float32)))  # running_var
    bn2 = (1.0 + 0.05 * jnp.arange(C, dtype=jnp.float32),
           0.05 * jnp.arange(C, dtype=jnp.float32),
           0.02 * jnp.arange(C, dtype=jnp.float32),
           1.0 + 0.1 * jnp.arange(C, dtype=jnp.float32))

    out = basic_block_forward(x, w1, bn1, w2, bn2)
    out = jax.block_until_ready(out)

    ref = jax.block_until_ready(reference_forward(x, w1, bn1, w2, bn2))
    np.testing.assert_allclose(np.asarray(out), np.asarray(ref), rtol=2e-2, atol=2e-2)

    print("KERNEL_OK")
</pallas_src>

<mosaic_0001>
module attributes {stable_mosaic.version = 11 : i64} {
  func.func @basic_block_kernel(%arg0: i32, %arg1: memref<1x16x64xf32, #tpu.memory_space<vmem>>, %arg2: memref<3x64x64xbf16, #tpu.memory_space<vmem>>, %arg3: memref<1x64xf32, #tpu.memory_space<vmem>>, %arg4: memref<1x64xf32, #tpu.memory_space<vmem>>, %arg5: memref<3x64x64xbf16, #tpu.memory_space<vmem>>, %arg6: memref<1x64xf32, #tpu.memory_space<vmem>>, %arg7: memref<1x64xf32, #tpu.memory_space<vmem>>, %arg8: memref<1x16x64xf32, #tpu.memory_space<vmem>>) attributes {dimension_semantics = [#tpu.dimension_semantics<parallel>], iteration_bounds = array<i64: 2>, scalar_prefetch = 0 : i64, scratch_operands = 0 : i64, tpu.core_type = #tpu.core_type<tc>, window_params = [{transform_indices = @transform_0, window_bounds = array<i64: 1, 16, 64>}, {pipeline_mode = #tpu.pipeline_mode<synchronous>, transform_indices = @transform_1, window_bounds = array<i64: 3, 64, 64>}, {pipeline_mode = #tpu.pipeline_mode<synchronous>, transform_indices = @transform_2, window_bounds = array<i64: 1, 64>}, {pipeline_mode = #tpu.pipeline_mode<synchronous>, transform_indices = @transform_3, window_bounds = array<i64: 1, 64>}, {pipeline_mode = #tpu.pipeline_mode<synchronous>, transform_indices = @transform_4, window_bounds = array<i64: 3, 64, 64>}, {pipeline_mode = #tpu.pipeline_mode<synchronous>, transform_indices = @transform_5, window_bounds = array<i64: 1, 64>}, {pipeline_mode = #tpu.pipeline_mode<synchronous>, transform_indices = @transform_6, window_bounds = array<i64: 1, 64>}, {transform_indices = @transform_7, window_bounds = array<i64: 1, 16, 64>}]} {
    %c0 = arith.constant 0 : index
    %c0_0 = arith.constant 0 : index
    %c0_1 = arith.constant 0 : index
    %0 = vector.load %arg1[%c0, %c0_0, %c0_1] : memref<1x16x64xf32, #tpu.memory_space<vmem>>, vector<1x16x64xf32>
    %1 = vector.shape_cast %0 : vector<1x16x64xf32> to vector<16x64xf32>
    %c1_i32 = arith.constant 1 : i32
    %2 = tpu.dynamic_rotate %1 by %c1_i32 dim 0 : vector<16x64xf32>, i32 -> vector<16x64xf32>
    %3 = tpu.iota {dimensions = array<i32: 0>} : vector<16x64xi32>
    %c1_i32_2 = arith.constant 1 : i32
    %4 = vector.broadcast %c1_i32_2 : i32 to vector<16x64xi32>
    %5 = arith.cmpi sge, %3, %4 : vector<16x64xi32>
    %cst = arith.constant 0.000000e+00 : f32
    %6 = vector.broadcast %cst : f32 to vector<16x64xf32>
    %7 = arith.select %5, %2, %6 : vector<16x64xi1>, vector<16x64xf32>
    %8 = arith.truncf %7 : vector<16x64xf32> to vector<16x64xbf16>
    %c0_3 = arith.constant 0 : index
    %c0_4 = arith.constant 0 : index
    %c0_5 = arith.constant 0 : index
    %9 = vector.load %arg2[%c0_3, %c0_4, %c0_5] : memref<3x64x64xbf16, #tpu.memory_space<vmem>>, vector<1x64x64xbf16>
    %10 = vector.shape_cast %9 : vector<1x64x64xbf16> to vector<64x64xbf16>
    %cst_6 = arith.constant dense<0.000000e+00> : vector<16x64xf32>
    %11 = tpu.matmul %8, %10, %cst_6 {dimension_numbers = #tpu.dot_dimension_numbers<[1], [0], [0], [1], [0, 0, 1, 1], [], []>} : vector<16x64xbf16>, vector<64x64xbf16>, vector<16x64xf32> -> vector<16x64xf32>
    %12 = arith.truncf %1 : vector<16x64xf32> to vector<16x64xbf16>
    %c1 = arith.constant 1 : index
    %c0_7 = arith.constant 0 : index
    %c0_8 = arith.constant 0 : index
    %13 = vector.load %arg2[%c1, %c0_7, %c0_8] : memref<3x64x64xbf16, #tpu.memory_space<vmem>>, vector<1x64x64xbf16>
    %14 = vector.shape_cast %13 : vector<1x64x64xbf16> to vector<64x64xbf16>
    %cst_9 = arith.constant dense<0.000000e+00> : vector<16x64xf32>
    %15 = tpu.matmul %12, %14, %cst_9 {dimension_numbers = #tpu.dot_dimension_numbers<[1], [0], [0], [1], [0, 0, 1, 1], [], []>} : vector<16x64xbf16>, vector<64x64xbf16>, vector<16x64xf32> -> vector<16x64xf32>
    %16 = arith.addf %11, %15 : vector<16x64xf32>
    %c15_i32 = arith.constant 15 : i32
    %17 = tpu.dynamic_rotate %1 by %c15_i32 dim 0 : vector<16x64xf32>, i32 -> vector<16x64xf32>
    %18 = tpu.iota {dimensions = array<i32: 0>} : vector<16x64xi32>
    %c15_i32_10 = arith.constant 15 : i32
    %19 = vector.broadcast %c15_i32_10 : i32 to vector<16x64xi32>
    %20 = arith.cmpi slt, %18, %19 : vector<16x64xi32>
    %cst_11 = arith.constant 0.000000e+00 : f32
    %21 = vector.broadcast %cst_11 : f32 to vector<16x64xf32>
    %22 = arith.select %20, %17, %21 : vector<16x64xi1>, vector<16x64xf32>
    %23 = arith.truncf %22 : vector<16x64xf32> to vector<16x64xbf16>
    %c2 = arith.constant 2 : index
    %c0_12 = arith.constant 0 : index
    %c0_13 = arith.constant 0 : index
    %24 = vector.load %arg2[%c2, %c0_12, %c0_13] : memref<3x64x64xbf16, #tpu.memory_space<vmem>>, vector<1x64x64xbf16>
    %25 = vector.shape_cast %24 : vector<1x64x64xbf16> to vector<64x64xbf16>
    %cst_14 = arith.constant dense<0.000000e+00> : vector<16x64xf32>
    %26 = tpu.matmul %23, %25, %cst_14 {dimension_numbers = #tpu.dot_dimension_numbers<[1], [0], [0], [1], [0, 0, 1, 1], [], []>} : vector<16x64xbf16>, vector<64x64xbf16>, vector<16x64xf32> -> vector<16x64xf32>
    %27 = arith.addf %16, %26 : vector<16x64xf32>
    %c0_15 = arith.constant 0 : index
    %c0_16 = arith.constant 0 : index
    %28 = vector.load %arg3[%c0_15, %c0_16] : memref<1x64xf32, #tpu.memory_space<vmem>>, vector<1x64xf32>
    %29 = vector.broadcast %28 : vector<1x64xf32> to vector<16x64xf32>
    %30 = arith.mulf %27, %29 : vector<16x64xf32>
    %c0_17 = arith.constant 0 : index
    %c0_18 = arith.constant 0 : index
    %31 = vector.load %arg4[%c0_17, %c0_18] : memref<1x64xf32, #tpu.memory_space<vmem>>, vector<1x64xf32>
    %32 = vector.broadcast %31 : vector<1x64xf32> to vector<16x64xf32>
    %33 = arith.addf %30, %32 : vector<16x64xf32>
    %cst_19 = arith.constant 0.000000e+00 : f32
    %34 = vector.broadcast %cst_19 : f32 to vector<16x64xf32>
    %35 = arith.maximumf %33, %34 : vector<16x64xf32>
    %c1_i32_20 = arith.constant 1 : i32
    %36 = tpu.dynamic_rotate %35 by %c1_i32_20 dim 0 : vector<16x64xf32>, i32 -> vector<16x64xf32>
    %37 = tpu.iota {dimensions = array<i32: 0>} : vector<16x64xi32>
    %c1_i32_21 = arith.constant 1 : i32
    %38 = vector.broadcast %c1_i32_21 : i32 to vector<16x64xi32>
    %39 = arith.cmpi sge, %37, %38 : vector<16x64xi32>
    %cst_22 = arith.constant 0.000000e+00 : f32
    %40 = vector.broadcast %cst_22 : f32 to vector<16x64xf32>
    %41 = arith.select %39, %36, %40 : vector<16x64xi1>, vector<16x64xf32>
    %42 = arith.truncf %41 : vector<16x64xf32> to vector<16x64xbf16>
    %c0_23 = arith.constant 0 : index
    %c0_24 = arith.constant 0 : index
    %c0_25 = arith.constant 0 : index
    %43 = vector.load %arg5[%c0_23, %c0_24, %c0_25] : memref<3x64x64xbf16, #tpu.memory_space<vmem>>, vector<1x64x64xbf16>
    %44 = vector.shape_cast %43 : vector<1x64x64xbf16> to vector<64x64xbf16>
    %cst_26 = arith.constant dense<0.000000e+00> : vector<16x64xf32>
    %45 = tpu.matmul %42, %44, %cst_26 {dimension_numbers = #tpu.dot_dimension_numbers<[1], [0], [0], [1], [0, 0, 1, 1], [], []>} : vector<16x64xbf16>, vector<64x64xbf16>, vector<16x64xf32> -> vector<16x64xf32>
    %46 = arith.truncf %35 : vector<16x64xf32> to vector<16x64xbf16>
    %c1_27 = arith.constant 1 : index
    %c0_28 = arith.constant 0 : index
    %c0_29 = arith.constant 0 : index
    %47 = vector.load %arg5[%c1_27, %c0_28, %c0_29] : memref<3x64x64xbf16, #tpu.memory_space<vmem>>, vector<1x64x64xbf16>
    %48 = vector.shape_cast %47 : vector<1x64x64xbf16> to vector<64x64xbf16>
    %cst_30 = arith.constant dense<0.000000e+00> : vector<16x64xf32>
    %49 = tpu.matmul %46, %48, %cst_30 {dimension_numbers = #tpu.dot_dimension_numbers<[1], [0], [0], [1], [0, 0, 1, 1], [], []>} : vector<16x64xbf16>, vector<64x64xbf16>, vector<16x64xf32> -> vector<16x64xf32>
    %50 = arith.addf %45, %49 : vector<16x64xf32>
    %c15_i32_31 = arith.constant 15 : i32
    %51 = tpu.dynamic_rotate %35 by %c15_i32_31 dim 0 : vector<16x64xf32>, i32 -> vector<16x64xf32>
    %52 = tpu.iota {dimensions = array<i32: 0>} : vector<16x64xi32>
    %c15_i32_32 = arith.constant 15 : i32
    %53 = vector.broadcast %c15_i32_32 : i32 to vector<16x64xi32>
    %54 = arith.cmpi slt, %52, %53 : vector<16x64xi32>
    %cst_33 = arith.constant 0.000000e+00 : f32
    %55 = vector.broadcast %cst_33 : f32 to vector<16x64xf32>
    %56 = arith.select %54, %51, %55 : vector<16x64xi1>, vector<16x64xf32>
    %57 = arith.truncf %56 : vector<16x64xf32> to vector<16x64xbf16>
    %c2_34 = arith.constant 2 : index
    %c0_35 = arith.constant 0 : index
    %c0_36 = arith.constant 0 : index
    %58 = vector.load %arg5[%c2_34, %c0_35, %c0_36] : memref<3x64x64xbf16, #tpu.memory_space<vmem>>, vector<1x64x64xbf16>
    %59 = vector.shape_cast %58 : vector<1x64x64xbf16> to vector<64x64xbf16>
    %cst_37 = arith.constant dense<0.000000e+00> : vector<16x64xf32>
    %60 = tpu.matmul %57, %59, %cst_37 {dimension_numbers = #tpu.dot_dimension_numbers<[1], [0], [0], [1], [0, 0, 1, 1], [], []>} : vector<16x64xbf16>, vector<64x64xbf16>, vector<16x64xf32> -> vector<16x64xf32>
    %61 = arith.addf %50, %60 : vector<16x64xf32>
    %c0_38 = arith.constant 0 : index
    %c0_39 = arith.constant 0 : index
    %62 = vector.load %arg6[%c0_38, %c0_39] : memref<1x64xf32, #tpu.memory_space<vmem>>, vector<1x64xf32>
    %63 = vector.broadcast %62 : vector<1x64xf32> to vector<16x64xf32>
    %64 = arith.mulf %61, %63 : vector<16x64xf32>
    %c0_40 = arith.constant 0 : index
    %c0_41 = arith.constant 0 : index
    %65 = vector.load %arg7[%c0_40, %c0_41] : memref<1x64xf32, #tpu.memory_space<vmem>>, vector<1x64xf32>
    %66 = vector.broadcast %65 : vector<1x64xf32> to vector<16x64xf32>
    %67 = arith.addf %64, %66 : vector<16x64xf32>
    %68 = arith.addf %67, %1 : vector<16x64xf32>
    %cst_42 = arith.constant 0.000000e+00 : f32
    %69 = vector.broadcast %cst_42 : f32 to vector<16x64xf32>
    %70 = arith.maximumf %68, %69 : vector<16x64xf32>
    %c0_43 = arith.constant 0 : index
    %c0_44 = arith.constant 0 : index
    %c0_45 = arith.constant 0 : index
    %71 = vector.load %arg8[%c0_43, %c0_44, %c0_45] : memref<1x16x64xf32, #tpu.memory_space<vmem>>, vector<1x16x64xf32>
    %72 = vector.shape_cast %71 : vector<1x16x64xf32> to vector<16x64xf32>
    %73 = vector.shape_cast %70 : vector<16x64xf32> to vector<1x16x64xf32>
    tpu.vector_store %arg8[%c0_43, %c0_44, %c0_45], %73 {strides = array<i32>} : memref<1x16x64xf32, #tpu.memory_space<vmem>>, vector<1x16x64xf32>,
    return
  }
  func.func @transform_0(%arg0: i32) -> (i32, i32, i32) {
    %c0_i32 = arith.constant 0 : i32
    %c0_i32_0 = arith.constant 0 : i32
    %c0_i32_1 = arith.constant 0 : i32
    return %arg0, %c0_i32, %c0_i32_0 : i32, i32, i32
  }
  func.func @transform_1(%arg0: i32) -> (i32, i32, i32) {
    %c0_i32 = arith.constant 0 : i32
    %c0_i32_0 = arith.constant 0 : i32
    %c0_i32_1 = arith.constant 0 : i32
    %c0_i32_2 = arith.constant 0 : i32
    return %c0_i32, %c0_i32_0, %c0_i32_1 : i32, i32, i32
  }
  func.func @transform_2(%arg0: i32) -> (i32, i32) {
    %c0_i32 = arith.constant 0 : i32
    %c0_i32_0 = arith.constant 0 : i32
    %c0_i32_1 = arith.constant 0 : i32
    return %c0_i32, %c0_i32_0 : i32, i32
  }
  func.func @transform_3(%arg0: i32) -> (i32, i32) {
    %c0_i32 = arith.constant 0 : i32
    %c0_i32_0 = arith.constant 0 : i32
    %c0_i32_1 = arith.constant 0 : i32
    return %c0_i32, %c0_i32_0 : i32, i32
  }
  func.func @transform_4(%arg0: i32) -> (i32, i32, i32) {
    %c0_i32 = arith.constant 0 : i32
    %c0_i32_0 = arith.constant 0 : i32
    %c0_i32_1 = arith.constant 0 : i32
    %c0_i32_2 = arith.constant 0 : i32
    return %c0_i32, %c0_i32_0, %c0_i32_1 : i32, i32, i32
  }
  func.func @transform_5(%arg0: i32) -> (i32, i32) {
    %c0_i32 = arith.constant 0 : i32
    %c0_i32_0 = arith.constant 0 : i32
    %c0_i32_1 = arith.constant 0 : i32
    return %c0_i32, %c0_i32_0 : i32, i32
  }
  func.func @transform_6(%arg0: i32) -> (i32, i32) {
    %c0_i32 = arith.constant 0 : i32
    %c0_i32_0 = arith.constant 0 : i32
    %c0_i32_1 = arith.constant 0 : i32
    return %c0_i32, %c0_i32_0 : i32, i32
  }
  func.func @transform_7(%arg0: i32) -> (i32, i32, i32) {
    %c0_i32 = arith.constant 0 : i32
    %c0_i32_0 = arith.constant 0 : i32
    %c0_i32_1 = arith.constant 0 : i32
    return %arg0, %c0_i32, %c0_i32_0 : i32, i32, i32
  }
}

</mosaic_0001>

<bundles_post_ra>
// kernel: tpu_custom_call.1
= control target key start
LH: loop header
LB: loop body
LE: loop exit
PB: predicated region body
PF: predicated region fallthrough
CT: control target
= control target key end

     0   :  { %12 = vsyncpa [#allocation3], 0  ;;  %s1798_s0 = inlined_call_operand.hbm [shape: f32[2,16,64], index: 0, kind: input, shape index: {}]   ;;  %s1799_s1 = inlined_call_operand.hbm [shape: bf16[3,64,64], index: 1, kind: input, shape index: {}]   ;;  %s1800_s2 = inlined_call_operand.vmem [shape: f32[1,64], index: 2, kind: input, shape index: {}]   ;;  %s1801_s3 = inlined_call_operand.vmem [shape: f32[1,64], index: 3, kind: input, shape index: {}]   ;;  %s1802_s4 = inlined_call_operand.hbm [shape: bf16[3,64,64], index: 4, kind: input, shape index: {}]   ;;  %s1803_s5 = inlined_call_operand.vmem [shape: f32[1,64], index: 5, kind: input, shape index: {}]   ;;  %s1804_s6 = inlined_call_operand.vmem [shape: f32[1,64], index: 6, kind: input, shape index: {}]   ;;  %s1805_s7 = inlined_call_operand.hbm [shape: f32[2,16,64], index: 7, kind: output, shape index: {}]  }
   0x1   :  { %14 = vsyncpa [#allocation3 + $0x1], 0 }
   0x2   :  { %15 = vsyncpa [#allocation6], 0 }
   0x3   :  { %16 = vsyncpa [#allocation4], 0 }
   0x4   :  { %18 = vsyncpa [#allocation4 + $0x1], 0  ;;  %s1464_s24 = smov 0   ;;  %s1466_s25 = smov 0  }
   0x5   :  { %s1468_s26 = smov 0   ;;  %s1470_s27 = smov 0  }
   0x6 LB: > { %s1485_s28 = sadd.s32 4294967295, %s1410_s27   ;;  %s983_s29 = sadd.s32 4294967294, %s1410_s27   ;;  %s1410_s27 = sphi %s1470_s27, %s1825_s27   ;;  %s1406_s26 = sphi %s1468_s26, %s1824_s26   ;;  %s1402_s25 = sphi %s1466_s25, %s1823_s25   ;;  %s1398_s24 = sphi %s1464_s24, %s1822_s24  }
   0x7   : > { %p44_p0 = scmp.ne.s32.totalorder %s1402_s25, %s1398_s24  ;;  %p1806_p1 = scmp.eq.s32.totalorder %s1485_s28, 0 }
   0x8   : > { %p200_p3 = scmp.eq.s32.totalorder %s983_s29, 1  ;;  %p984_p5 = scmp.ge.s32.totalorder %s1410_s27, 1 }
   0x9   : > { %p1494_p4 = por %p1806_p1, %p44_p0  ;;  %p207_p7 = scmp.lt.s32.totalorder %s1410_s27, 3 }
   0xa   : > { %p1499_p6 = por %p200_p3, %p44_p0  ;;  %s1412_s10 = smov [#allocation5]  }
   0xb   : > { %s1809_s30 = scalar_select %p1494_p4, 1, 0 }
   0xc   : > { %s1810_s8 = scalar_select %p1499_p6, 1, 0 }
   0xd   : > { %p1504_p8 = pnand %p984_p5, %p207_p7  ;;  %s219_s11 = sshll.u32 %s1412_s10, 4  ;;  %s1508_s11 = int_to_ptr.vmem [resolvable:$true] %s219_s11 }
   0xe   : > { %s1413_s13 = smov [#allocation7]   ;;  %s1254_s17 = scalar_lea.hbm %s1799_s1, 1536 }
   0xf   : > { %p1167_p9 = pneg %p1504_p8  ;;  %s238_s14 = sshll.u32 %s1413_s13, 4  ;;  %s1519_s14 = int_to_ptr.vmem [resolvable:$true] %s238_s14 }
  0x10   : > { %p1255_p12 = scmp.ne.s32.totalorder %s1799_s1, %s1254_s17  ;;  %p1261_p5 = scmp.lt.u32.totalorder %s1254_s17, %s1799_s1 }
  0x11   : > { %p1515_p11 = pnand %p1167_p9, %p1806_p1 }
  0x13   : > { %p1256_p13 = pneg %p1515_p11 }
  0x15   : > { %p1257_p0 = pnand %p1256_p13, %p1255_p12 }
  0x17   : > { %p1258_p3 = pneg %p1257_p0 }
  0x19   : > { %p1263_p7 = pnand %p1261_p5, %p1258_p3 }
  0x1b   : > { %1266 = shalt.err (!%p1263_p7)
}
  0x1c   : > { %s1267_s22 = scalar_lea.vmem %s1508_s11, 1536  ;;  %p1275_p2 = scmp.lt.s32.totalorder %s1508_s11, %s1508_s11 }
  0x1d   : > { %p1268_p9 = scmp.ne.s32.totalorder %s1508_s11, %s1267_s22  ;;  %p1276_p12 = scmp.lt.s32.totalorder %s1267_s22, %s1267_s22 }
  0x1f   : > { %p1270_p10 = pnand %p1268_p9, %p1256_p13  ;;  %p1277_p0 = por %p1276_p12, %p1275_p2 }
  0x21   : > { %p1271_p1 = pneg %p1270_p10 }
  0x23   : > { %p1278_p6 = pnand %p1277_p0, %p1271_p1 }
  0x25   : > { %1281 = shalt.err (!%p1278_p6)
}
  0x26   : > { %s1414_s23 = smov 64   ;;  %s1415_s29 = smov 4  }
  0x27   : > { %1170 = dma.hbm_to_vmem [thread:$0]  (!%p1515_p11), %s1799_s1, 1536, %s1508_s11, [#allocation6], %s1414_s23, %s1414_s23, %s1415_s29  }
  0x28   : > { %s1282_s17 = scalar_lea.hbm %s1802_s4, 1536 }
  0x29   : > { %p1283_p2 = scmp.ne.s32.totalorder %s1802_s4, %s1282_s17  ;;  %p1289_p10 = scmp.lt.u32.totalorder %s1282_s17, %s1802_s4 }
  0x2b   : > { %p1285_p1 = pnand %p1283_p2, %p1256_p13 }
  0x2d   : > { %p1286_p6 = pneg %p1285_p1 }
  0x2f   : > { %p1291_p3 = pnand %p1289_p10, %p1286_p6 }
  0x31   : > { %1294 = shalt.err (!%p1291_p3)
}
  0x32   : > { %s1295_s11 = scalar_lea.vmem %s1519_s14, 1536  ;;  %p1303_p12 = scmp.lt.s32.totalorder %s1519_s14, %s1519_s14 }
  0x33   : > { %p1296_p5 = scmp.ne.s32.totalorder %s1519_s14, %s1295_s11  ;;  %p1304_p0 = scmp.lt.s32.totalorder %s1295_s11, %s1295_s11 }
  0x35   : > { %p1298_p7 = pnand %p1296_p5, %p1256_p13  ;;  %p1305_p2 = por %p1304_p0, %p1303_p12 }
  0x37   : > { %p1299_p9 = pneg %p1298_p7 }
  0x39   : > { %p1306_p1 = pnand %p1305_p2, %p1299_p9 }
  0x3b   : > { %1309 = shalt.err (!%p1306_p1)
}
  0x3c   : > { %1173 = dma.hbm_to_vmem [thread:$0]  (!%p1515_p11), %s1802_s4, 1536, %s1519_s14, [#allocation6], %s1414_s23, %s1414_s23, %s1415_s29  }
  0x3d   : > { %s1574_s13 = sadd.s32 1, %s1410_s27   ;;  %s31_s12 = sadd.s32 1, %s1406_s26 }
  0x3e   : > { %s28_s15 = ssub.s32 %s1410_s27, %s1574_s13  ;;  %p38_p13 = scmp.ne.s32.totalorder %s1406_s26, %s1402_s25 }
  0x3f   : > { %p29_p6 = scmp.eq.s32.totalorder %s28_s15, 0  ;;  %p39_p10 = scmp.eq.s32.totalorder %s1410_s27, 0 }
  0x40   : > { %p1813_p3 = scmp.eq.s32.totalorder %s1485_s28, 1  ;;  %p1184_p7 = scmp.lt.s32.totalorder %s1410_s27, 2 }
  0x41   : > { %s1590_s17 = scalar_select %p29_p6, %s1406_s26, %s31_s12  }
  0x42   : > { %p1584_p5 = por %p1813_p3, %p38_p13  ;;  %p40_p9 = por %p39_p10, %p38_p13 }
  0x43   : > { %s258_s18 = sand.u32 1, %s1406_s26   ;;  %s1035_s14 = sshll.u32 %s1410_s27, 8 }
  0x44   : > { %s1814_s16 = scalar_select %p1584_p5, 1, 0 }
  0x45   : > { %s988_s19 = sshll.u32 %s258_s18, 4  ;;  %s1597_s20 = scalar_lea.hbm %s1798_s0, %s1035_s14 }
  0x46   : > { %s262_s21 = scalar_lea.vmem [#allocation2], %s988_s19  ;;  %p1601_p11 = pnand %p1184_p7, %p40_p9 }
  0x47   : > { %s269_s11 = sshll.u32 %s262_s21, 4  ;;  %s1605_s10 = scalar_lea.sflag [#allocation3], %s258_s18  ;;  %s1599_s11 = int_to_ptr.vmem [resolvable:$true] %s269_s11 }
  0x48   : > { %s1310_s12 = scalar_lea.hbm %s1597_s20, 256  ;;  %p1312_p0 = pneg %p1601_p11 }
  0x49   : > { %p1311_p12 = scmp.ne.s32.totalorder %s1597_s20, %s1310_s12  ;;  %s1315_s14 = scalar_lea.hbm %s1798_s0, 512 }
  0x4a   : > { %p1316_p13 = scmp.lt.u32.totalorder %s1597_s20, %s1798_s0  ;;  %p1317_p6 = scmp.lt.u32.totalorder %s1315_s14, %s1310_s12 }
  0x4b   : > { %p1313_p2 = pnand %p1312_p0, %p1311_p12  ;;  %p1319_p3 = scmp.lt.u32.totalorder %s1310_s12, %s1597_s20 }
  0x4c   : > { %p1318_p10 = por %p1317_p6, %p1316_p13 }
  0x4d   : > { %p1314_p1 = pneg %p1313_p2 }
  0x4e   : > { %p1320_p7 = por %p1319_p3, %p1318_p10 }
  0x50   : > { %p1321_p9 = pnand %p1320_p7, %p1314_p1 }
  0x52   : > { %1324 = shalt.err (!%p1321_p9)
}
  0x53   : > { %s1325_s18 = scalar_lea.vmem %s1599_s11, 256  ;;  %s1416_s21 = smov [#allocation2]  }
  0x54   : > { %p1326_p12 = scmp.ne.s32.totalorder %s1599_s11, %s1325_s18  ;;  %s1330_s15 = sshll.u32 %s1416_s21, 4  ;;  %s1331_s15 = int_to_ptr.vmem [resolvable:$false] %s1330_s15 }
  0x55   : > { %s1332_s19 = scalar_lea.vmem %s1331_s15, 512  ;;  %p1333_p4 = scmp.lt.s32.totalorder %s1599_s11, %s1331_s15 }
  0x56   : > { %p1328_p2 = pnand %p1326_p12, %p1312_p0  ;;  %p1334_p13 = scmp.lt.s32.totalorder %s1332_s19, %s1325_s18 }
  0x58   : > { %p1329_p5 = pneg %p1328_p2  ;;  %p1335_p6 = por %p1334_p13, %p1333_p4 }
  0x5a   : > { %p1336_p10 = pnand %p1335_p6, %p1329_p5 }
  0x5c   : > { %1339 = shalt.err (!%p1336_p10)
}
  0x5d   : > { %s1417_s12 = smov 128   ;;  %s1418_s14 = smov 8  }
  0x5e   : > { %1177 = dma.hbm_to_vmem [thread:$0]  (!%p1601_p11), %s1597_s20, 256, %s1599_s11, %s1605_s10, %s1417_s12, %s1417_s12, %s1418_s14  }
  0x5f   : > { %281 = sbr.rel (%p1504_p8) target bundleno = 647 (0x287), region = 48  ;;  %s1636_s23 = sand.u32 (!%p1504_p8), 1, %s1402_s25  }
  0x60   : > { %s992_s29 = sshll.u32 (!%p1504_p8), %s1636_s23, 4  ;;  %s284_s18 = scalar_lea.sflag (!%p1504_p8), [#allocation3], %s1636_s23 }
  0x61   : > { %s287_s21 = scalar_lea.vmem (!%p1504_p8), [#allocation2], %s992_s29  ;;  %p1816_p4 = scmp.ne.s32.totalorder (!%p1504_p8), %s1809_s30, 0 }
  0x66   : > { %1385 = dma.done.wait (%p1816_p4), %s284_s18, 256  }
  0x67   : > { %1387 = vsyncadd (%p1816_p4), %s284_s18, 4294967040  ;;  %p1817_p5 = scmp.eq.s32.totalorder %s1485_s28, 0 }
  0x69   : > { %1389 = dma.done.wait (%p1817_p5), [#allocation6], 3072   ;;  %p1818_p8 = pmov %p1817_p5 }
  0x6a   : > { %v1419_v0 = vmov 0.0   ;;  %vm1420_vm0 = vmmov 0   ;;  %v1230_v1 = vld [vmem:[#allocation5 + $0x20] sm:$0xff]   ;;  %v1231_v2 = vld [vmem:[#allocation5 + $0x28] sm:$0xff]   ;;  %v331_v3 = vlaneseq  ;;  %v1232_v4 = vld [vmem:[#allocation5 + $0x30] sm:$0xff]   ;;  %vm384_vm1 = vcmask 523264  }
  0x6b   : > { %1391 = vsyncadd (%p1818_p8), [#allocation6], 4294964224  ;;  %1067 = vmatprep.subr.bf16.mxu0 %v1419_v0  ;;  %1075 = vmatprep.mubr.msk.bf16.mxu0 %vm1420_vm0, %v1419_v0  ;;  %v1233_v5 = vld [vmem:[#allocation5 + $0x38] sm:$0xff]   ;;  %v1660_v7 = vld [vmem:[%s287_s21] sm:$0xff]  ;;  %s1036_s12 = sshll.u32 %s1485_s28, 8  ;;  %s325_s14 = scalar_lea.vmem [#allocation8], %s992_s29 }
  0x6c   : > { %1103 = vmatprep.subr.bf16.mxu1 %v1419_v0  ;;  %1111 = vmatprep.mubr.msk.bf16.mxu1 %vm1420_vm0, %v1419_v0  ;;  %v1658_v6 = vshrl.u32 %v331_v3, 7  ;;  %v1662_v8 = vld [vmem:[%s287_s21 + $0x8] sm:$0xff]  ;;  %v1234_v9 = vld [vmem:[#allocation5] sm:$0xff]   ;;  %v329_v10 = vrot.slane %v1660_v7, 7  ;;  %v1236_v16 = vld [vmem:[#allocation5 + $0x10] sm:$0xff]   ;;  %v497_v24 = vrot.slane %v1660_v7, 1  ;;  %s1750_s9 = scalar_lea.hbm %s1805_s7, %s1036_s12 }
  0x6d   : > { %1068 = vmatpush3.bf16.msra.mxu0 %v1230_v1  ;;  %v350_v11 = vpack.c.bf16 %v1662_v8, %v1660_v7  ;;  %v1242_v12 = vld [vmem:[#allocation7 + $0x20] sm:$0xff]   ;;  %v330_v13 = vrot.slane %v1662_v8, 7  ;;  %v1243_v14 = vld [vmem:[#allocation7 + $0x28] sm:$0xff]   ;;  %v1237_v18 = vld [vmem:[#allocation5 + $0x18] sm:$0xff]   ;;  %v498_v25 = vrot.slane %v1662_v8, 1  ;;  %s891_s18 = sshll.u32 %s325_s14, 4  ;;  %s1752_s18 = int_to_ptr.vmem [resolvable:$true] %s891_s18 }
  0x6e   : > { %1069 = vmatprep.subr.bf16.mxu0 %v1419_v0  ;;  %vm333_vm2 = vcmp.lt.s32.totalorder %v1658_v6, 1  ;;  %1104 = vmatpush3.bf16.msra.mxu1 %v1242_v12  ;;  %v1235_v15 = vld [vmem:[#allocation5 + $0x8] sm:$0xff]   ;;  %vm337_vm3 = vcmp.ge.s32.totalorder %v1658_v6, 1  ;;  %v1238_v22 = vld [vmem:[#allocation5 + $0x40] sm:$0xff]   ;;  %v336_v26 = vadd.s32 8, %v1658_v6  ;;  %vm499_vm4 = vcmp.lt.s32.totalorder %v1658_v6, 7 }
  0x6f   : > { %1105 = vmatprep.subr.bf16.mxu1 %v1419_v0  ;;  %v335_v17 = vsel %vm333_vm2, %v330_v13, %v329_v10  ;;  %v334_v19 = vsel %vm333_vm2, %v329_v10, %v330_v13  ;;  %v1239_v23 = vld [vmem:[#allocation5 + $0x48] sm:$0xff]   ;;  %v1240_v27 = vld [vmem:[#allocation5 + $0x50] sm:$0xff]   ;;  %v501_v28 = vsel %vm499_vm4, %v498_v25, %v497_v24  ;;  %v1241_v29 = vld [vmem:[#allocation5 + $0x58] sm:$0xff]   ;;  %v500_v30 = vsel %vm499_vm4, %v497_v24, %v498_v25  ;;  %s878_s28 = scalar_lea.sflag [#allocation4], %s1636_s23  ;;  %s1340_s29 = scalar_lea.vmem %s1752_s18, 256 }
  0x70   : > { %v339_v20 = vsel %vm337_vm3, %v335_v17, 0.0  ;;  %vm503_vm5 = vcmp.lt.s32.totalorder %v336_v26, 15  ;;  %v1244_v33 = vld [vmem:[#allocation7 + $0x30] sm:$0xff]   ;;  %v1245_v34 = vld [vmem:[#allocation7 + $0x38] sm:$0xff]   ;;  %v1011_v35 = vld [vmem:[%s1800_s2] ss:$0 sm:$0xff]  ;;  %p1341_p11 = scmp.ne.s32.totalorder %s1752_s18, %s1340_s29 }
  0x71   : > { %1070 = vmatpush3.bf16.msra.mxu0 %v1231_v2  ;;  %v341_v21 = vpack.c.bf16 %v334_v19, %v339_v20  ;;  %v505_v31 = vsel %vm503_vm5, %v501_v28, 0.0  ;;  %v1012_v37 = vld [vmem:[%s1801_s3] ss:$0 sm:$0xff]  ;;  %v1247_v57 = vld [vmem:[#allocation7 + $0x8] sm:$0xff]   ;;  %v1248_v62 = vld [vmem:[#allocation7 + $0x10] sm:$0xff]   ;;  %p1819_p0 = scmp.ne.s32.totalorder %s1814_s16, 0 }
  0x72   : > { %1071 = vmatprep.subr.bf16.mxu0 %v1419_v0  ;;  %1106 = vmatpush3.bf16.msra.mxu1 %v1243_v14  ;;  %v506_v32 = vpack.c.bf16 %v505_v31, %v500_v30  ;;  %v1246_v48 = vld [vmem:[#allocation7] sm:$0xff]   ;;  %v1249_v63 = vld [vmem:[#allocation7 + $0x18] sm:$0xff]   ;;  %v1251_v2 = vld [vmem:[#allocation7 + $0x48] sm:$0xff]   ;;  %s1421_s20 = smov [#allocation8]  }
  0x73   : > { %1107 = vmatprep.subr.bf16.mxu1 %v1419_v0  ;;  %v1250_v1 = vld [vmem:[#allocation7 + $0x40] sm:$0xff]   ;;  %v1252_v3 = vld [vmem:[#allocation7 + $0x50] sm:$0xff]   ;;  %p1342_p1 = pnand %p1341_p11, %p1819_p0  ;;  %s1344_s11 = sshll.u32 %s1421_s20, 4  ;;  %s1345_s11 = int_to_ptr.vmem [resolvable:$false] %s1344_s11 }
  0x74   : > { %s1346_s22 = scalar_lea.vmem %s1345_s11, 512  ;;  %p1347_p7 = scmp.lt.s32.totalorder %s1752_s18, %s1345_s11 }
  0x75   : > { %1072 = vmatpush3.bf16.msra.mxu0 %v1232_v4  ;;  %v1253_v4 = vld [vmem:[#allocation7 + $0x58] sm:$0xff]   ;;  %p1343_p3 = pneg %p1342_p1  ;;  %p1348_p9 = scmp.lt.s32.totalorder %s1346_s22, %s1340_s29 }
  0x76   : > { %1073 = vmatprep.subr.bf16.mxu0 %v1419_v0  ;;  %1108 = vmatpush3.bf16.msra.mxu1 %v1244_v33 }
  0x77   : > { %1109 = vmatprep.subr.bf16.mxu1 %v1419_v0  ;;  %p1349_p12 = por %p1348_p9, %p1347_p7 }
  0x79   : > { %1074 = vmatpush3.bf16.msra.mxu0 %v1233_v5  ;;  %v1028_v5 = vld [vmem:[%s1803_s5] ss:$0 sm:$0xff]  ;;  %p1350_p2 = pnand %p1349_p12, %p1343_p3 }
  0x7a   : > { %1079 = vmatprep.subr.bf16.mxu0 %v1419_v0  ;;  %1110 = vmatpush3.bf16.msra.mxu1 %v1245_v34 }
  0x7b   : > { %1115 = vmatprep.subr.bf16.mxu1 %v1419_v0 }
  0x7c   : > { %1076 = vmatmul.mubr.msk.bf16.vlgmr.msra.gmra.mrb[0].mxu0 %vm384_vm1, %v350_v11 }
  0x7d   : > { %1080 = vmatpush3.bf16.msra.mxu0 %v1234_v9  ;;  %1087 = vmatprep.mubr.msk.bf16.mxu0 %vm1420_vm0, %v1419_v0  ;;  %v1029_v9 = vld [vmem:[%s1804_s6] ss:$0 sm:$0xff] }
  0x7e   : > { %1081 = vmatprep.subr.bf16.mxu0 %v1419_v0 }
  0x81   : > { %1082 = vmatpush3.bf16.msra.mxu0 %v1235_v15 }
  0x82   : > { %1083 = vmatprep.subr.bf16.mxu0 %v1419_v0 }
  0x85   : > { %1084 = vmatpush3.bf16.msra.mxu0 %v1236_v16 }
  0x86   : > { %1085 = vmatprep.subr.bf16.mxu0 %v1419_v0 }
  0x89   : > { %1086 = vmatpush3.bf16.msra.mxu0 %v1237_v18 }
  0x8a   : > { %1091 = vmatprep.subr.bf16.mxu0 %v1419_v0 }
  0x8c   : > { %1088 = vmatmul.mubr.msk.bf16.vlgmr.msra.gmra.mrb[0].mxu0 %vm384_vm1, %v341_v21 }
  0x8d   : > { %1092 = vmatpush3.bf16.msra.mxu0 %v1238_v22  ;;  %1099 = vmatprep.mubr.msk.bf16.mxu0 %vm1420_vm0, %v1419_v0 }
  0x8e   : > { %1093 = vmatprep.subr.bf16.mxu0 %v1419_v0 }
  0x91   : > { %1094 = vmatpush3.bf16.msra.mxu0 %v1239_v23 }
  0x92   : > { %1095 = vmatprep.subr.bf16.mxu0 %v1419_v0 }
  0x95   : > { %1096 = vmatpush3.bf16.msra.mxu0 %v1240_v27 }
  0x96   : > { %1097 = vmatprep.subr.bf16.mxu0 %v1419_v0 }
  0x99   : > { %1098 = vmatpush3.bf16.msra.mxu0 %v1241_v29 }
  0x9c   : > { %1100 = vmatmul.mubr.msk.bf16.vlgmr.msra.gmra.mrb[0].mxu0 %vm384_vm1, %v506_v32 }
 0x16f   : > { %v577_v36 = vpop.f32.mrb[0].mxu0 }
 0x170   : > { %v593_v38 = vmul.f32 %v1011_v35, %v577_v36  ;;  %v1101_v39 = vpop.f32.mrb[1].mxu0 }
 0x171   : > { %v580_v40 = vpop.f32.mrb[2].mxu0 }
 0x172   : > { %v602_v41 = vadd.f32 %v1012_v37, %v593_v38  ;;  %v594_v42 = vmul.f32 %v1011_v35, %v580_v40  ;;  %v1102_v43 = vpop.f32.mrb[3].mxu0 }
 0x174   : > { %v604_v44 = vmax.f32 %v602_v41, 0.0  ;;  %v603_v45 = vadd.f32 %v1012_v37, %v594_v42 }
 0x176   : > { %v605_v46 = vmax.f32 %v603_v45, 0.0  ;;  %v606_v47 = vrot.slane %v604_v44, 7  ;;  %v767_v49 = vrot.slane %v604_v44, 1 }
 0x178   : > { %v607_v50 = vrot.slane %v605_v46, 7  ;;  %v768_v51 = vrot.slane %v605_v46, 1  ;;  %v621_v52 = vpack.c.bf16 %v605_v46, %v604_v44 }
 0x17a   : > { %v608_v53 = vsel %vm333_vm2, %v606_v47, %v607_v50  ;;  %v609_v54 = vsel %vm333_vm2, %v607_v50, %v606_v47  ;;  %v769_v55 = vsel %vm499_vm4, %v767_v49, %v768_v51  ;;  %v770_v56 = vsel %vm499_vm4, %v768_v51, %v767_v49  ;;  %1112 = vmatmul.mubr.msk.bf16.vlgmr.msra.gmra.mrb[0].mxu1 %vm384_vm1, %v621_v52 }
 0x17b   : > { %1116 = vmatpush3.bf16.msra.mxu1 %v1246_v48  ;;  %1123 = vmatprep.mubr.msk.bf16.mxu1 %vm1420_vm0, %v1419_v0  ;;  %v610_v58 = vsel %vm337_vm3, %v609_v54, 0.0  ;;  %v772_v59 = vsel %vm503_vm5, %v770_v56, 0.0 }
 0x17c   : > { %1117 = vmatprep.subr.bf16.mxu1 %v1419_v0  ;;  %v612_v60 = vpack.c.bf16 %v608_v53, %v610_v58  ;;  %v773_v61 = vpack.c.bf16 %v772_v59, %v769_v55 }
 0x17f   : > { %1118 = vmatpush3.bf16.msra.mxu1 %v1247_v57 }
 0x180   : > { %1119 = vmatprep.subr.bf16.mxu1 %v1419_v0 }
 0x183   : > { %1120 = vmatpush3.bf16.msra.mxu1 %v1248_v62 }
 0x184   : > { %1121 = vmatprep.subr.bf16.mxu1 %v1419_v0 }
 0x187   : > { %1122 = vmatpush3.bf16.msra.mxu1 %v1249_v63 }
 0x188   : > { %1127 = vmatprep.subr.bf16.mxu1 %v1419_v0 }
 0x18a   : > { %1124 = vmatmul.mubr.msk.bf16.vlgmr.msra.gmra.mrb[0].mxu1 %vm384_vm1, %v612_v60 }
 0x18b   : > { %1128 = vmatpush3.bf16.msra.mxu1 %v1250_v1  ;;  %1135 = vmatprep.mubr.msk.bf16.mxu1 %vm1420_vm0, %v1419_v0 }
 0x18c   : > { %1129 = vmatprep.subr.bf16.mxu1 %v1419_v0 }
 0x18f   : > { %1130 = vmatpush3.bf16.msra.mxu1 %v1251_v2 }
 0x190   : > { %1131 = vmatprep.subr.bf16.mxu1 %v1419_v0 }
 0x193   : > { %1132 = vmatpush3.bf16.msra.mxu1 %v1252_v3 }
 0x194   : > { %1133 = vmatprep.subr.bf16.mxu1 %v1419_v0 }
 0x197   : > { %1134 = vmatpush3.bf16.msra.mxu1 %v1253_v4 }
 0x19a   : > { %1136 = vmatmul.mubr.msk.bf16.vlgmr.msra.gmra.mrb[0].mxu1 %vm384_vm1, %v773_v61 }
 0x26d   : > { %v844_v6 = vpop.f32.mrb[0].mxu1 }
 0x26e   : > { %v860_v10 = vmul.f32 %v1028_v5, %v844_v6  ;;  %v1137_v11 = vpop.f32.mrb[1].mxu1 }
 0x26f   : > { %v847_v12 = vpop.f32.mrb[2].mxu1 }
 0x270   : > { %v869_v13 = vadd.f32 %v1029_v9, %v860_v10  ;;  %v861_v14 = vmul.f32 %v1028_v5, %v847_v12  ;;  %v1138_v15 = vpop.f32.mrb[3].mxu1 }
 0x272   : > { %v871_v0 = vadd.f32 %v869_v13, %v1660_v7  ;;  %v870_v16 = vadd.f32 %v1029_v9, %v861_v14 }
 0x274   : > { %v873_v17 = vmax.f32 %v871_v0, 0.0  ;;  %v872_v18 = vadd.f32 %v870_v16, %v1662_v8 }
 0x276   : > { %875 = vst.msk [vmem:[%s325_s14] sm:$0xff] %vm384_vm1, %v873_v17  ;;  %v874_v7 = vmax.f32 %v872_v18, 0.0 }
 0x278   : > { %876 = vst.msk [vmem:[%s325_s14 + $0x8] sm:$0xff] %vm384_vm1, %v874_v7 }
 0x279   : > { %1353 = shalt.err (!%p1350_p2)
}
 0x27a   : > { %s1354_s10 = scalar_lea.hbm %s1750_s9, 256  ;;  %s1358_s12 = scalar_lea.hbm %s1805_s7, 512 }
 0x27b   : > { %p1355_p13 = scmp.ne.s32.totalorder %s1750_s9, %s1354_s10  ;;  %p1359_p4 = scmp.lt.u32.totalorder %s1750_s9, %s1805_s7 }
 0x27c   : > { %p1360_p5 = scmp.lt.u32.totalorder %s1358_s12, %s1354_s10  ;;  %p1362_p11 = scmp.lt.u32.totalorder %s1354_s10, %s1750_s9 }
 0x27d   : > { %p1356_p6 = pnand %p1355_p13, %p1819_p0 }
 0x27e   : > { %p1361_p8 = por %p1360_p5, %p1359_p4 }
 0x27f   : > { %p1357_p10 = pneg %p1356_p6 }
 0x280   : > { %p1363_p1 = por %p1362_p11, %p1361_p8 }
 0x282   : > { %p1364_p3 = pnand %p1363_p1, %p1357_p10 }
 0x284   : > { %1367 = shalt.err (!%p1364_p3)
}
 0x285   : > { %s1422_s30 = smov 128   ;;  %s1423_s29 = smov 8  }
 0x286   : > { %1165 = dma.vmem_to_hbm [thread:$0]  (%p1819_p0), %s1752_s18, 256, %s1750_s9, %s878_s28, %s1422_s30, %s1422_s30, %s1423_s29  }
 0x287 PF: > { %s906_s20 = sand.u32 1, %s1398_s24   ;;  %p1820_p7 = scmp.ne.s32.totalorder %s1810_s8, 0 }
 0x288   : > { %p1821_p9 = scmp.ge.s32.totalorder %s1410_s27, 2  ;;  %s907_s11 = scalar_lea.sflag [#allocation4], %s906_s20 }
 0x28a   : > { %p1179_p12 = pnand %p1821_p9, %p1820_p7 }
 0x28c   : > { %1393 = dma.done.wait (!%p1179_p12), %s907_s11, 256  }
 0x28d   : > { %1395 = vsyncadd (!%p1179_p12), %s907_s11, 4294967040  ;;  %p21_p2 = scmp.ge.s32.totalorder %s1574_s13, 4   ;;  %s1822_s24 = smov %s1402_s25 }
 0x28e   : > { %s1823_s25 = smov %s1406_s26  ;;  %s1824_s26 = smov %s1590_s17 }
 0x28f   : > { %s1825_s27 = smov %s1574_s13  ;;  %23 = sbr.rel (!%p21_p2) target bundleno = 6 (0x6), region = 105 }
 0x296   :  { %912 = vsyncpa [#allocation3], 1 }
 0x297   :  { %914 = vsyncpa [#allocation3 + $0x1], 1 }
 0x298   :  { %915 = vsyncpa [#allocation6], 1 }
 0x299   :  { %916 = vsyncpa [#allocation4], 1 }
 0x29a   :  { %918 = vsyncpa [#allocation4 + $0x1], 1 }

</bundles_post_ra>
